<compile_context>
chip_gen: v6e
topology: v6e:2x2x1
jax: 0.10.0
libtpu: 0.0.40
codegen_flags: <defaults>
</compile_context>

<pallas_src>
import functools

import jax
import jax.numpy as jnp
from jax.experimental import pallas as pl
from jax.experimental.pallas import tpu as pltpu


_LANE = 128                            # feature dims padded to multiples of this
_TM = 512                              # output-row tile (destination nodes)
_TK = 2048                             # reduction tile (source nodes); multiple of _TM
_X_RESIDENT_BYTES = 8 * 1024 * 1024    # keep X fully VMEM-resident below this
_VMEM_LIMIT = 48 * 1024 * 1024         # fits v7x's 64 MiB physical with headroom


def _round_up(x, m):
    return ((x + m - 1) // m) * m


def _padded_n(n):
    """Padded node count compatible with the chosen tiles (divisible by tm and tk)."""
    if n <= _TM:
        return _round_up(n, 128)
    if n <= _TK:
        return _round_up(n, _TM)
    return _round_up(n, _TK)


def _sage_layer_kernel(a_ref, xk_ref, xm_ref, inv_ref, ws_ref, wn_ref, b_ref,
                       o_ref, acc_ref, *, tk, xk_resident, apply_relu):
    """One fused SAGEConv('mean') layer, tiled over (row tile i, reduction tile k).

    a_ref  : (TM, TK)  int8    binary adjacency tile A01[i, k]
    xk_ref : (TK, dpi) bf16    source features for reduction tile k
             or (Np, dpi) bf16 full resident X (sliced with pl.ds) when xk_resident
    xm_ref : (TM, dpi) bf16    self features for row tile i
    inv_ref: (TM, 1)   f32     exact 1/in_degree per destination row
    ws_ref : (dpi, dpo) bf16   W_self^T  (pre-transposed, zero-padded)
    wn_ref : (dpi, dpo) bf16   W_neigh^T (pre-transposed, zero-padded)
    b_ref  : (1, dpo)  f32     bias (zero-padded)
    o_ref  : (TM, dpo)         output tile
    acc_ref: (TM, dpi) f32     neighbor-sum accumulator
    """
    k = pl.program_id(1)

    @pl.when(k == 0)
    def _init():
        acc_ref[...] = jnp.zeros_like(acc_ref)

    # Accumulate A01[i, k] @ X[k] in f32; int8 0/1 -> bf16 is exact.
    a = a_ref[...].astype(jnp.bfloat16)
    if xk_resident:
        off = pl.multiple_of(k * tk, tk)
        xk = xk_ref[pl.ds(off, tk), :]
    else:
        xk = xk_ref[...]
    acc_ref[...] += jnp.dot(a, xk, preferred_element_type=jnp.float32)

    @pl.when(k == pl.num_programs(1) - 1)
    def _finalize():
        # Exact mean: f32 inverse-degree scale of the f32-accumulated neighbor sum.
        agg = (acc_ref[...] * inv_ref[...]).astype(jnp.bfloat16)
        out = (jnp.dot(xm_ref[...], ws_ref[...], preferred_element_type=jnp.float32)
               + jnp.dot(agg, wn_ref[...], preferred_element_type=jnp.float32)
               + b_ref[...])
        if apply_relu:
            out = jnp.maximum(out, 0.0)
        o_ref[...] = out.astype(o_ref.dtype)


def sage_conv_mean(a01_pad, inv_pad, x_pad, ws, wn, b_pad, *, apply_relu, out_dtype):
    """Fused SAGEConv('mean') layer on padded inputs.

    a01_pad : [Np, Np] int8 binary adjacency (zero-padded)
    inv_pad : [Np, 1]  f32  exact inverse in-degree (zero for padded / isolated rows)
    x_pad   : [Np, Dpi] bf16 node features (zero-padded, Dpi % 128 == 0)
    ws, wn  : [Dpi, Dpo] bf16 pre-transposed projection weights
    b_pad   : [1, Dpo] f32 bias
    """
    np_, _ = a01_pad.shape
    dpi = x_pad.shape[1]
    dpo = ws.shape[1]

    tm = min(_TM, np_)
    if np_ // tm < 2 and np_ >= 256:
        tm = np_ // 2                  # >=2 row tiles so both v7x TensorCores get work
    tk = min(_TK, np_)
    grid = (np_ // tm, np_ // tk)

    # Keep the whole source-feature matrix VMEM-resident when it is small enough:
    # removes the per-row-tile re-stream of X on the mem-bound aggregation loop.
    xk_resident = np_ * dpi * x_pad.dtype.itemsize <= _X_RESIDENT_BYTES
    if xk_resident:
        xk_spec = pl.BlockSpec((np_, dpi), lambda i, k: (0, 0))
    else:
        xk_spec = pl.BlockSpec((tk, dpi), lambda i, k: (k, 0))

    kernel = functools.partial(_sage_layer_kernel, tk=tk,
                               xk_resident=xk_resident, apply_relu=apply_relu)

    return pl.pallas_call(
        kernel,
        out_shape=jax.ShapeDtypeStruct((np_, dpo), out_dtype),
        grid_spec=pltpu.PrefetchScalarGridSpec(
            num_scalar_prefetch=0,
            grid=grid,
            in_specs=[
                pl.BlockSpec((tm, tk), lambda i, k: (i, k)),    # A01 tile (int8)
                xk_spec,                                        # X (reduction rows)
                pl.BlockSpec((tm, dpi), lambda i, k: (i, 0)),   # X (self rows)
                pl.BlockSpec((tm, 1), lambda i, k: (i, 0)),     # inverse in-degree
                pl.BlockSpec((dpi, dpo), lambda i, k: (0, 0)),  # W_self^T  (bf16)
                pl.BlockSpec((dpi, dpo), lambda i, k: (0, 0)),  # W_neigh^T (bf16)
                pl.BlockSpec((1, dpo), lambda i, k: (0, 0)),    # bias (f32)
            ],
            out_specs=pl.BlockSpec((tm, dpo), lambda i, k: (i, 0)),
            scratch_shapes=[pltpu.VMEM((tm, dpi), jnp.float32)],
        ),
        compiler_params=pltpu.CompilerParams(
            dimension_semantics=("parallel", "arbitrary"),
            vmem_limit_bytes=_VMEM_LIMIT,
        ),
    )(a01_pad, x_pad, x_pad, inv_pad, ws, wn, b_pad)


def _pack_layer(w_self, w_neigh, bias):
    """Pre-transpose, zero-pad, and cast the two projection weights to bf16."""
    dout, din = w_self.shape
    dpi = _round_up(din, _LANE)
    dpo = _round_up(dout, _LANE)
    ws = jnp.zeros((dpi, dpo), jnp.bfloat16).at[:din, :dout].set(
        w_self.T.astype(jnp.bfloat16))
    wn = jnp.zeros((dpi, dpo), jnp.bfloat16).at[:din, :dout].set(
        w_neigh.T.astype(jnp.bfloat16))
    b_pad = jnp.zeros((1, dpo), jnp.float32).at[0, :dout].set(bias.astype(jnp.float32))
    return ws, wn, b_pad


def giph_embedding_graphsage(a01, inv_deg, x, params):
    """h = relu(conv1(g, x)); h = relu(conv2(g, h)); h = conv3(g, h)"""
    n, din = x.shape
    np_ = _padded_n(n)
    dpi0 = _round_up(din, _LANE)

    # int8 binary adjacency, exact f32 inverse degrees, bf16 features; zero-pad.
    a_pad = jnp.zeros((np_, np_), jnp.int8).at[:n, :n].set(a01.astype(jnp.int8))
    inv_pad = jnp.zeros((np_, 1), jnp.float32).at[:n, :].set(inv_deg.astype(jnp.float32))
    x_pad = jnp.zeros((np_, dpi0), jnp.bfloat16).at[:n, :din].set(x.astype(jnp.bfloat16))

    layer_order = (("conv1", True), ("conv2", True), ("conv3", False))
    packed = [(_pack_layer(*params[name]), relu) for name, relu in layer_order]

    h = x_pad
    for idx, ((ws, wn, b_pad), relu) in enumerate(packed):
        last = idx == len(packed) - 1
        h = sage_conv_mean(
            a_pad, inv_pad, h, ws, wn, b_pad,
            apply_relu=relu,
            out_dtype=jnp.float32 if last else jnp.bfloat16,
        )

    out_dim = params["conv3"][0].shape[0]
    return h[:n, :out_dim]


def init_sage_params(key, in_dim, out_dim):
    """Deterministic init: fc_self.W, fc_neigh.W (bias=False in DGL), shared bias."""
    k1, k2 = jax.random.split(key)
    scale = 1.0 / jnp.sqrt(jnp.float32(in_dim))
    w_self = jax.random.uniform(k1, (out_dim, in_dim), jnp.float32, -scale, scale)
    w_neigh = jax.random.uniform(k2, (out_dim, in_dim), jnp.float32, -scale, scale)
    bias = jnp.zeros((out_dim,), jnp.float32)
    return (w_self, w_neigh, bias)


def build_mean_adjacency(n, edges):
    """Binary adjacency A01[dst, src] = 1 plus exact f32 inverse in-degree per dst."""
    src = jnp.array([e[0] for e in edges], jnp.int32)
    dst = jnp.array([e[1] for e in edges], jnp.int32)
    a01 = jnp.zeros((n, n), jnp.float32).at[dst, src].set(1.0)
    deg = a01.sum(axis=1, keepdims=True)
    inv_deg = jnp.where(deg > 0, 1.0 / jnp.maximum(deg, 1.0), 0.0)
    return a01, inv_deg


if __name__ == "__main__":
    # Small deterministic problem.
    N = 8
    NODE_DIM = 16
    HIDDEN_DIM = 32
    OUT_DIM = 16

    key = jax.random.PRNGKey(0)
    kx, k1, k2, k3 = jax.random.split(key, 4)

    x = jax.random.normal(kx, (N, NODE_DIM), jnp.float32)

    # Simple directed graph: ring edges i->(i+1)%N and skip edges i->(i+2)%N
    edges = [(i, (i + 1) % N) for i in range(N)] + [(i, (i + 2) % N) for i in range(N)]
    a01, inv_deg = build_mean_adjacency(N, edges)

    params = {
        "conv1": init_sage_params(k1, NODE_DIM, HIDDEN_DIM),
        "conv2": init_sage_params(k2, HIDDEN_DIM, HIDDEN_DIM),
        "conv3": init_sage_params(k3, HIDDEN_DIM, OUT_DIM),
    }

    out = giph_embedding_graphsage(a01, inv_deg, x, params)
    out = jax.block_until_ready(out)

    # Pure-JAX reference mirroring the kernel's bf16 rounding points
    # (features / weights / aggregated neighbor means in bf16; everything else f32).
    def _bf(v):
        return v.astype(jnp.bfloat16).astype(jnp.float32)

    def ref_layer(a, inv, h, p, relu):
        ws, wn, b = p
        hp = jax.lax.Precision.HIGHEST
        neigh = _bf(jnp.dot(a, h, precision=hp) * inv)
        r = (jnp.dot(h, _bf(ws).T, precision=hp)
             + jnp.dot(neigh, _bf(wn).T, precision=hp) + b)
        return jnp.maximum(r, 0.0) if relu else r

    h_r = _bf(x)
    h_r = _bf(ref_layer(a01, inv_deg, h_r, params["conv1"], True))
    h_r = _bf(ref_layer(a01, inv_deg, h_r, params["conv2"], True))
    h_r = ref_layer(a01, inv_deg, h_r, params["conv3"], False)

    assert out.shape == (N, OUT_DIM)
    assert out.dtype == jnp.float32
    max_diff = jnp.max(jnp.abs(out - h_r))
    assert jnp.allclose(out, h_r, atol=2e-2, rtol=2e-2), f"max abs diff {max_diff}"

    print("KERNEL_OK")
</pallas_src>

<mosaic_0001>
module attributes {stable_mosaic.version = 11 : i64} {
  func.func @_sage_layer_kernel(%arg0: i32, %arg1: i32, %arg2: memref<128x128xi8, #tpu.memory_space<vmem>>, %arg3: memref<128x128xbf16, #tpu.memory_space<vmem>>, %arg4: memref<128x128xbf16, #tpu.memory_space<vmem>>, %arg5: memref<128x1xf32, #tpu.memory_space<vmem>>, %arg6: memref<128x128xbf16, #tpu.memory_space<vmem>>, %arg7: memref<128x128xbf16, #tpu.memory_space<vmem>>, %arg8: memref<1x128xf32, #tpu.memory_space<vmem>>, %arg9: memref<128x128xbf16, #tpu.memory_space<vmem>>, %arg10: memref<128x128xf32, #tpu.memory_space<vmem>>) attributes {dimension_semantics = [#tpu.dimension_semantics<parallel>, #tpu.dimension_semantics<arbitrary>], iteration_bounds = array<i64: 1, 1>, scalar_prefetch = 0 : i64, scratch_operands = 1 : i64, tpu.core_type = #tpu.core_type<tc>, window_params = [{transform_indices = @transform_0, window_bounds = array<i64: 128, 128>}, {pipeline_mode = #tpu.pipeline_mode<synchronous>, transform_indices = @transform_1, window_bounds = array<i64: 128, 128>}, {transform_indices = @transform_2, window_bounds = array<i64: 128, 128>}, {transform_indices = @transform_3, window_bounds = array<i64: 128, 1>}, {pipeline_mode = #tpu.pipeline_mode<synchronous>, transform_indices = @transform_4, window_bounds = array<i64: 128, 128>}, {pipeline_mode = #tpu.pipeline_mode<synchronous>, transform_indices = @transform_5, window_bounds = array<i64: 128, 128>}, {pipeline_mode = #tpu.pipeline_mode<synchronous>, transform_indices = @transform_6, window_bounds = array<i64: 1, 128>}, {transform_indices = @transform_7, window_bounds = array<i64: 128, 128>}]} {
    %c0_i32 = arith.constant 0 : i32
    %0 = arith.cmpi eq, %arg1, %c0_i32 : i32
    %1 = arith.extui %0 : i1 to i32
    %c0_i32_0 = arith.constant 0 : i32
    %2 = arith.cmpi ne, %1, %c0_i32_0 : i32
    scf.if %2 {
      %cst_9 = arith.constant 0.000000e+00 : f32
      %16 = vector.broadcast %cst_9 : f32 to vector<128x128xf32>
      %c0_10 = arith.constant 0 : index
      %c0_11 = arith.constant 0 : index
      %17 = vector.load %arg10[%c0_10, %c0_11] : memref<128x128xf32, #tpu.memory_space<vmem>>, vector<128x128xf32>
      tpu.vector_store %arg10[%c0_10, %c0_11], %16 {strides = array<i32>} : memref<128x128xf32, #tpu.memory_space<vmem>>, vector<128x128xf32>,
    } else {
    }
    %c0 = arith.constant 0 : index
    %c0_1 = arith.constant 0 : index
    %3 = vector.load %arg2[%c0, %c0_1] : memref<128x128xi8, #tpu.memory_space<vmem>>, vector<128x128xi8>
    %4 = arith.sitofp %3 : vector<128x128xi8> to vector<128x128xbf16>
    %c128_i32 = arith.constant 128 : i32
    %5 = arith.muli %arg1, %c128_i32 : i32
    %6 = tpu.assume_multiple %5, 128 : i32
    %7 = arith.index_cast %6 : i32 to index
    %c0_2 = arith.constant 0 : index
    %8 = vector.load %arg3[%7, %c0_2] : memref<128x128xbf16, #tpu.memory_space<vmem>>, vector<128x128xbf16>
    %c0_3 = arith.constant 0 : index
    %c0_4 = arith.constant 0 : index
    %9 = vector.load %arg10[%c0_3, %c0_4] : memref<128x128xf32, #tpu.memory_space<vmem>>, vector<128x128xf32>
    %cst = arith.constant dense<0.000000e+00> : vector<128x128xf32>
    %10 = tpu.matmul %4, %8, %cst {dimension_numbers = #tpu.dot_dimension_numbers<[1], [0], [0], [1], [0, 0, 1, 1], [], []>} : vector<128x128xbf16>, vector<128x128xbf16>, vector<128x128xf32> -> vector<128x128xf32>
    %11 = arith.addf %9, %10 : vector<128x128xf32>
    %c0_5 = arith.constant 0 : index
    %c0_6 = arith.constant 0 : index
    %12 = vector.load %arg10[%c0_5, %c0_6] : memref<128x128xf32, #tpu.memory_space<vmem>>, vector<128x128xf32>
    tpu.vector_store %arg10[%c0_5, %c0_6], %11 {strides = array<i32>} : memref<128x128xf32, #tpu.memory_space<vmem>>, vector<128x128xf32>,
    %c0_i32_7 = arith.constant 0 : i32
    %13 = arith.cmpi eq, %arg1, %c0_i32_7 : i32
    %14 = arith.extui %13 : i1 to i32
    %c0_i32_8 = arith.constant 0 : i32
    %15 = arith.cmpi ne, %14, %c0_i32_8 : i32
    scf.if %15 {
      %c0_9 = arith.constant 0 : index
      %c0_10 = arith.constant 0 : index
      %16 = vector.load %arg10[%c0_9, %c0_10] : memref<128x128xf32, #tpu.memory_space<vmem>>, vector<128x128xf32>
      %c0_11 = arith.constant 0 : index
      %c0_12 = arith.constant 0 : index
      %17 = vector.load %arg5[%c0_11, %c0_12] : memref<128x1xf32, #tpu.memory_space<vmem>>, vector<128x1xf32>
      %18 = vector.broadcast %17 : vector<128x1xf32> to vector<128x128xf32>
      %19 = arith.mulf %16, %18 : vector<128x128xf32>
      %20 = arith.truncf %19 : vector<128x128xf32> to vector<128x128xbf16>
      %c0_13 = arith.constant 0 : index
      %c0_14 = arith.constant 0 : index
      %21 = vector.load %arg4[%c0_13, %c0_14] : memref<128x128xbf16, #tpu.memory_space<vmem>>, vector<128x128xbf16>
      %c0_15 = arith.constant 0 : index
      %c0_16 = arith.constant 0 : index
      %22 = vector.load %arg6[%c0_15, %c0_16] : memref<128x128xbf16, #tpu.memory_space<vmem>>, vector<128x128xbf16>
      %cst_17 = arith.constant dense<0.000000e+00> : vector<128x128xf32>
      %23 = tpu.matmul %21, %22, %cst_17 {dimension_numbers = #tpu.dot_dimension_numbers<[1], [0], [0], [1], [0, 0, 1, 1], [], []>} : vector<128x128xbf16>, vector<128x128xbf16>, vector<128x128xf32> -> vector<128x128xf32>
      %c0_18 = arith.constant 0 : index
      %c0_19 = arith.constant 0 : index
      %24 = vector.load %arg7[%c0_18, %c0_19] : memref<128x128xbf16, #tpu.memory_space<vmem>>, vector<128x128xbf16>
      %cst_20 = arith.constant dense<0.000000e+00> : vector<128x128xf32>
      %25 = tpu.matmul %20, %24, %cst_20 {dimension_numbers = #tpu.dot_dimension_numbers<[1], [0], [0], [1], [0, 0, 1, 1], [], []>} : vector<128x128xbf16>, vector<128x128xbf16>, vector<128x128xf32> -> vector<128x128xf32>
      %26 = arith.addf %23, %25 : vector<128x128xf32>
      %c0_21 = arith.constant 0 : index
      %c0_22 = arith.constant 0 : index
      %27 = vector.load %arg8[%c0_21, %c0_22] : memref<1x128xf32, #tpu.memory_space<vmem>>, vector<1x128xf32>
      %28 = vector.broadcast %27 : vector<1x128xf32> to vector<128x128xf32>
      %29 = arith.addf %26, %28 : vector<128x128xf32>
      %cst_23 = arith.constant 0.000000e+00 : f32
      %30 = vector.broadcast %cst_23 : f32 to vector<128x128xf32>
      %31 = arith.maximumf %29, %30 : vector<128x128xf32>
      %32 = arith.truncf %31 : vector<128x128xf32> to vector<128x128xbf16>
      %c0_24 = arith.constant 0 : index
      %c0_25 = arith.constant 0 : index
      %33 = vector.load %arg9[%c0_24, %c0_25] : memref<128x128xbf16, #tpu.memory_space<vmem>>, vector<128x128xbf16>
      tpu.vector_store %arg9[%c0_24, %c0_25], %32 {strides = array<i32>} : memref<128x128xbf16, #tpu.memory_space<vmem>>, vector<128x128xbf16>,
    } else {
    }
    return
  }
  func.func @transform_0(%arg0: i32, %arg1: i32) -> (i32, i32) {
    %c0_i32 = arith.constant 0 : i32
    return %arg0, %arg1 : i32, i32
  }
  func.func @transform_1(%arg0: i32, %arg1: i32) -> (i32, i32) {
    %c0_i32 = arith.constant 0 : i32
    %c0_i32_0 = arith.constant 0 : i32
    %c0_i32_1 = arith.constant 0 : i32
    return %c0_i32, %c0_i32_0 : i32, i32
  }
  func.func @transform_2(%arg0: i32, %arg1: i32) -> (i32, i32) {
    %c0_i32 = arith.constant 0 : i32
    %c0_i32_0 = arith.constant 0 : i32
    return %arg0, %c0_i32 : i32, i32
  }
  func.func @transform_3(%arg0: i32, %arg1: i32) -> (i32, i32) {
    %c0_i32 = arith.constant 0 : i32
    %c0_i32_0 = arith.constant 0 : i32
    return %arg0, %c0_i32 : i32, i32
  }
  func.func @transform_4(%arg0: i32, %arg1: i32) -> (i32, i32) {
    %c0_i32 = arith.constant 0 : i32
    %c0_i32_0 = arith.constant 0 : i32
    %c0_i32_1 = arith.constant 0 : i32
    return %c0_i32, %c0_i32_0 : i32, i32
  }
  func.func @transform_5(%arg0: i32, %arg1: i32) -> (i32, i32) {
    %c0_i32 = arith.constant 0 : i32
    %c0_i32_0 = arith.constant 0 : i32
    %c0_i32_1 = arith.constant 0 : i32
    return %c0_i32, %c0_i32_0 : i32, i32
  }
  func.func @transform_6(%arg0: i32, %arg1: i32) -> (i32, i32) {
    %c0_i32 = arith.constant 0 : i32
    %c0_i32_0 = arith.constant 0 : i32
    %c0_i32_1 = arith.constant 0 : i32
    return %c0_i32, %c0_i32_0 : i32, i32
  }
  func.func @transform_7(%arg0: i32, %arg1: i32) -> (i32, i32) {
    %c0_i32 = arith.constant 0 : i32
    %c0_i32_0 = arith.constant 0 : i32
    return %arg0, %c0_i32 : i32, i32
  }
}

</mosaic_0001>

<bundles_post_ra>
// kernel: tpu_custom_call.1
= control target key start
LH: loop header
LB: loop body
LE: loop exit
PB: predicated region body
PF: predicated region fallthrough
CT: control target
= control target key end

     0   :  { %12 = vsyncpa [#allocation4], 0  ;;  %s1619_s0 = inlined_call_operand.hbm [shape: s8[128,128], index: 0, kind: input, shape index: {}]   ;;  %s1620_s1 = inlined_call_operand.vmem [shape: bf16[128,128], index: 1, kind: input, shape index: {}]   ;;  %s1621_s2 = inlined_call_operand.vmem [shape: bf16[128,128], index: 2, kind: input, shape index: {}]   ;;  %s1622_s3 = inlined_call_operand.vmem [shape: f32[128,1], index: 3, kind: input, shape index: {}]   ;;  %s1623_s4 = inlined_call_operand.hbm [shape: bf16[128,128], index: 4, kind: input, shape index: {}]   ;;  %s1624_s5 = inlined_call_operand.hbm [shape: bf16[128,128], index: 5, kind: input, shape index: {}]   ;;  %s1625_s6 = inlined_call_operand.vmem [shape: f32[1,128], index: 6, kind: input, shape index: {}]   ;;  %s1626_s7 = inlined_call_operand.hbm [shape: bf16[128,128], index: 7, kind: output, shape index: {}]  }
   0x1   :  { %13 = vsyncpa [#allocation7], 0 }
   0x2   :  { %14 = vsyncpa [#allocation5], 0  ;;  %s1380_s24 = smov [#allocation6]  }
   0x3   :  { %s38_s25 = sshll.u32 %s1380_s24, 4  ;;  %s39_s25 = int_to_ptr.vmem [resolvable:$true] %s38_s25 }
   0x4   :  { %s1302_s26 = scalar_lea.vmem %s39_s25, 1024  ;;  %p1307_p1 = scmp.lt.s32.totalorder %s39_s25, %s39_s25 }
   0x5   :  { %p1303_p0 = scmp.ne.s32.totalorder %s39_s25, %s1302_s26  ;;  %p1308_p2 = scmp.lt.s32.totalorder %s1302_s26, %s1302_s26 }
   0x7   :  { %p1309_p3 = por %p1308_p2, %p1307_p1 }
   0x9   :  { %p1310_p4 = pnand %p1309_p3, %p1303_p0 }
   0xb   :  { %1313 = shalt.err (!%p1310_p4)
}
   0xc   :  { %s1381_s27 = smov 64   ;;  %s1382_s28 = smov 4  }
   0xd   :  { %44 = dma.hbm_to_vmem [thread:$0]  %s1623_s4, 1024, %s39_s25, [#allocation7], %s1381_s27, %s1381_s27, %s1382_s28  }
   0xe   :  { %s1383_s8 = smov [#allocation3]  }
   0xf   :  { %s20_s9 = sshll.u32 %s1383_s8, 4  ;;  %s21_s9 = int_to_ptr.vmem [resolvable:$true] %s20_s9 }
  0x10   :  { %s1322_s10 = scalar_lea.vmem %s21_s9, 512  ;;  %p1327_p6 = scmp.lt.s32.totalorder %s21_s9, %s21_s9 }
  0x11   :  { %p1323_p5 = scmp.ne.s32.totalorder %s21_s9, %s1322_s10  ;;  %p1328_p7 = scmp.lt.s32.totalorder %s1322_s10, %s1322_s10 }
  0x13   :  { %p1329_p8 = por %p1328_p7, %p1327_p6 }
  0x15   :  { %p1330_p9 = pnand %p1329_p8, %p1323_p5 }
  0x17   :  { %1333 = shalt.err (!%p1330_p9)
}
  0x18   :  { %s1384_s11 = smov 128   ;;  %s1385_s12 = smov 8  }
  0x19   :  { %26 = dma.hbm_to_vmem [thread:$0]  %s1619_s0, 512, %s21_s9, [#allocation4], %s1384_s11, %s1384_s11, %s1385_s12  }
  0x1a   :  { %s1386_s15 = smov [#allocation8]  }
  0x1b   :  { %s50_s16 = sshll.u32 %s1386_s15, 4  ;;  %s51_s16 = int_to_ptr.vmem [resolvable:$true] %s50_s16 }
  0x1c   :  { %s1342_s4 = scalar_lea.vmem %s51_s16, 1024  ;;  %p1347_p11 = scmp.lt.s32.totalorder %s51_s16, %s51_s16 }
  0x1d   :  { %p1343_p10 = scmp.ne.s32.totalorder %s51_s16, %s1342_s4  ;;  %p1348_p12 = scmp.lt.s32.totalorder %s1342_s4, %s1342_s4 }
  0x1f   :  { %p1349_p13 = por %p1348_p12, %p1347_p11 }
  0x21   :  { %p1350_p0 = pnand %p1349_p13, %p1343_p10 }
  0x23   :  { %1353 = shalt.err (!%p1350_p0)
}
  0x24   :  { %56 = dma.hbm_to_vmem [thread:$0]  %s1624_s5, 1024, %s51_s16, [#allocation7], %s1381_s27, %s1381_s27, %s1382_s28  }
  0x25   :  { %1374 = dma.done.wait [#allocation4], 512  }
  0x26   :  { %1375 = vsyncadd [#allocation4], 4294966784 }
  0x27   :  { %1376 = dma.done.wait [#allocation7], 2048  }
  0x28   :  { %1377 = vsyncadd [#allocation7], 4294965248  ;;  %v1387_v0 = vmov 0   ;;  %v1262_v1 = vld [vmem:[%s1620_s1 + $0x38] sm:$0xff]   ;;  %v1263_v2 = vld [vmem:[%s1620_s1 + $0x30] sm:$0xff]  }
  0x29   :  { %1260 = vset.pattern.permute.xlu0 %v1387_v0  ;;  %1261 = vset.pattern.permute.xlu1 %v1387_v0  ;;  %v1264_v3 = vld [vmem:[%s1620_s1 + $0x28] sm:$0xff]   ;;  %v1265_v4 = vld [vmem:[%s1620_s1 + $0x20] sm:$0xff]   ;;  %v336_v8 = vld [vmem:[%s1622_s3 + $0x10] sm:$0xff] }
  0x2a   :  { %1139 = vmatprep.subr.bf16.mxu0 %v1262_v1  ;;  %v1456_v5 = vld [vmem:[#allocation3] sm:$0xff]  ;;  %362 = vperm.xlu1 %1261, %v336_v8   ;;  %v335_v9 = vld [vmem:[%s1622_s3 + $0x8] sm:$0xff]  ;;  %v337_v10 = vld [vmem:[%s1622_s3 + $0x18] sm:$0xff] }
  0x2b   :  { %1140 = vmatpush3.bf16.msra.mxu0 %v1262_v1  ;;  %v93_v6 = vunpack.c.l.s8.bf16 %v1456_v5  ;;  %v334_v7 = vld [vmem:[%s1622_s3] sm:$0xff]  ;;  %v1266_v11 = vld [vmem:[%s1620_s1 + $0x18] sm:$0xff]   ;;  %v339_v13 = vld [vmem:[%s1622_s3 + $0x28] sm:$0xff]  ;;  %v94_v31 = vunpack.c.h.s8.bf16 %v1456_v5 }
  0x2c   :  { %1141 = vmatprep.subr.bf16.mxu0 %v1263_v2  ;;  %352 = vperm.xlu0 %1260, %v334_v7   ;;  %v338_v12 = vld [vmem:[%s1622_s3 + $0x20] sm:$0xff]  ;;  %v1270_v14 = vld [vmem:[#allocation8 + $0x38] sm:$0xff]   ;;  %v1267_v15 = vld [vmem:[%s1620_s1 + $0x10] sm:$0xff]  }
  0x2d   :  { %1155 = vmatprep.mubr.bf16.mxu0 %v93_v6  ;;  %1171 = vmatprep.subr.bf16.mxu1 %v1270_v14  ;;  %v1272_v16 = vld [vmem:[#allocation8 + $0x30] sm:$0xff]   ;;  %v1268_v17 = vld [vmem:[%s1620_s1 + $0x8] sm:$0xff]   ;;  %v341_v19 = vld [vmem:[%s1622_s3 + $0x38] sm:$0xff] }
  0x2e   :  { %367 = vperm.xlu1 %1261, %v337_v10   ;;  %v340_v18 = vld [vmem:[%s1622_s3 + $0x30] sm:$0xff]  ;;  %1172 = vmatpush3.bf16.msra.mxu1 %v1270_v14  ;;  %v1274_v20 = vld [vmem:[#allocation8 + $0x28] sm:$0xff]   ;;  %v342_v21 = vld [vmem:[%s1622_s3 + $0x40] sm:$0xff] }
  0x2f   :  { %1142 = vmatpush3.bf16.msra.mxu0 %v1263_v2  ;;  %1173 = vmatprep.subr.bf16.mxu1 %v1272_v16  ;;  %v343_v22 = vld [vmem:[%s1622_s3 + $0x48] sm:$0xff]  ;;  %v1269_v23 = vld [vmem:[%s1620_s1] sm:$0xff]   ;;  %v344_v25 = vld [vmem:[%s1622_s3 + $0x50] sm:$0xff] }
  0x30   :  { %1143 = vmatprep.subr.bf16.mxu0 %v1264_v3  ;;  %357 = vperm.xlu0 %1260, %v335_v9   ;;  %v1276_v24 = vld [vmem:[#allocation8 + $0x20] sm:$0xff]   ;;  %v345_v26 = vld [vmem:[%s1622_s3 + $0x58] sm:$0xff]  ;;  %v90_v27 = vld [vmem:[#allocation3 + $0x8] sm:$0xff] }
  0x31   :  { %v1507_v28 = vld [vmem:[#allocation6 + $0x38] sm:$0xff]   ;;  %v346_v30 = vld [vmem:[%s1622_s3 + $0x60] sm:$0xff]  ;;  %v347_v32 = vld [vmem:[%s1622_s3 + $0x68] sm:$0xff]  ;;  %v95_v33 = vunpack.c.l.s8.bf16 %v90_v27  ;;  %v96_v40 = vunpack.c.h.s8.bf16 %v90_v27 }
  0x32   :  { %377 = vperm.xlu1 %1261, %v339_v13   ;;  %1174 = vmatpush3.bf16.msra.mxu1 %v1272_v16  ;;  %v1278_v29 = vld [vmem:[#allocation8 + $0x18] sm:$0xff]   ;;  %v1516_v34 = vld [vmem:[#allocation6 + $0x30] sm:$0xff]   ;;  %v1527_v39 = vld [vmem:[#allocation6 + $0x28] sm:$0xff]  }
  0x33   :  { %1144 = vmatpush3.bf16.msra.mxu0 %v1264_v3  ;;  %1175 = vmatprep.subr.bf16.mxu1 %v1274_v20  ;;  %v1280_v35 = vld [vmem:[#allocation8 + $0x10] sm:$0xff]   ;;  %v349_v38 = vld [vmem:[%s1622_s3 + $0x78] sm:$0xff]  ;;  %v1531_v42 = vld [vmem:[#allocation6 + $0x20] sm:$0xff]  }
  0x34   :  { %1145 = vmatprep.subr.bf16.mxu0 %v1265_v4  ;;  %372 = vperm.xlu0 %1260, %v338_v12   ;;  %v348_v36 = vld [vmem:[%s1622_s3 + $0x70] sm:$0xff]  ;;  %v92_v43 = vld [vmem:[#allocation3 + $0x18] sm:$0xff]  ;;  %v1282_v49 = vld [vmem:[#allocation8 + $0x8] sm:$0xff]  }
  0x35   :  { %v91_v37 = vld [vmem:[#allocation3 + $0x10] sm:$0xff]  ;;  %v1535_v44 = vld [vmem:[#allocation6 + $0x18] sm:$0xff]   ;;  %v99_v46 = vunpack.c.l.s8.bf16 %v92_v43  ;;  %v100_v47 = vunpack.c.h.s8.bf16 %v92_v43  ;;  %v1544_v50 = vld [vmem:[#allocation6 + $0x8] sm:$0xff]  }
  0x36   :  { %387 = vperm.xlu1 %1261, %v341_v19   ;;  %1176 = vmatpush3.bf16.msra.mxu1 %v1274_v20  ;;  %v97_v41 = vunpack.c.l.s8.bf16 %v91_v37  ;;  %v98_v45 = vunpack.c.h.s8.bf16 %v91_v37  ;;  %v1540_v48 = vld [vmem:[#allocation6 + $0x10] sm:$0xff]   ;;  %v1284_v51 = vld [vmem:[#allocation8] sm:$0xff]   ;;  %v1287_v54 = vld [vmem:[%s1621_s2 + $0x8] sm:$0xff]  }
  0x37   :  { %1146 = vmatpush3.bf16.msra.mxu0 %v1265_v4  ;;  %1177 = vmatprep.subr.bf16.mxu1 %v1276_v24  ;;  %v1548_v52 = vld [vmem:[#allocation6] sm:$0xff]   ;;  %v1288_v55 = vld [vmem:[%s1621_s2 + $0x10] sm:$0xff]   ;;  %v1289_v56 = vld [vmem:[%s1621_s2 + $0x18] sm:$0xff]  }
  0x38   :  { %1147 = vmatprep.subr.bf16.mxu0 %v1266_v11  ;;  %382 = vperm.xlu0 %1260, %v340_v18   ;;  %v1286_v53 = vld [vmem:[%s1621_s2] sm:$0xff]  }
  0x3a   :  { %397 = vperm.xlu1 %1261, %v343_v22   ;;  %1178 = vmatpush3.bf16.msra.mxu1 %v1276_v24 }
  0x3b   :  { %1148 = vmatpush3.bf16.msra.mxu0 %v1266_v11  ;;  %1179 = vmatprep.subr.bf16.mxu1 %v1278_v29 }
  0x3c   :  { %1149 = vmatprep.subr.bf16.mxu0 %v1267_v15  ;;  %392 = vperm.xlu0 %1260, %v342_v21  }
  0x3e   :  { %407 = vperm.xlu1 %1261, %v345_v26   ;;  %1180 = vmatpush3.bf16.msra.mxu1 %v1278_v29 }
  0x3f   :  { %1150 = vmatpush3.bf16.msra.mxu0 %v1267_v15  ;;  %1181 = vmatprep.subr.bf16.mxu1 %v1280_v35 }
  0x40   :  { %1151 = vmatprep.subr.bf16.mxu0 %v1268_v17  ;;  %402 = vperm.xlu0 %1260, %v344_v25  }
  0x42   :  { %417 = vperm.xlu1 %1261, %v347_v32   ;;  %1182 = vmatpush3.bf16.msra.mxu1 %v1280_v35 }
  0x43   :  { %1152 = vmatpush3.bf16.msra.mxu0 %v1268_v17  ;;  %1183 = vmatprep.subr.bf16.mxu1 %v1282_v49 }
  0x44   :  { %1153 = vmatprep.subr.bf16.mxu0 %v1269_v23  ;;  %412 = vperm.xlu0 %1260, %v346_v30  }
  0x46   :  { %427 = vperm.xlu1 %1261, %v349_v38   ;;  %1184 = vmatpush3.bf16.msra.mxu1 %v1282_v49 }
  0x47   :  { %1154 = vmatpush3.bf16.msra.mxu0 %v1269_v23  ;;  %1185 = vmatprep.subr.bf16.mxu1 %v1284_v51 }
  0x48   :  { %1203 = vmatprep.subr.bf16.mxu0 %v1507_v28  ;;  %422 = vperm.xlu0 %1260, %v348_v36  }
  0x4a   :  { %1156 = vmatmul.mubr.bf16.vlgmr.msra.gmra.mxu0 %v94_v31  ;;  %1186 = vmatpush3.bf16.msra.mxu1 %v1284_v51 }
  0x4b   :  { %1159 = vmatprep.mubr.bf16.mxu0 %v95_v33  ;;  %1204 = vmatpush3.bf16.msra.mxu0 %v1507_v28 }
  0x4c   :  { %1205 = vmatprep.subr.bf16.mxu0 %v1516_v34  ;;  %1235 = vmatprep.subr.bf16.mxu1 %v1507_v28 }
  0x4f   :  { %1206 = vmatpush3.bf16.msra.mxu0 %v1516_v34 }
  0x50   :  { %1207 = vmatprep.subr.bf16.mxu0 %v1527_v39 }
  0x52   :  { %1160 = vmatmul.mubr.bf16.gmra.mxu0 %v96_v40 }
  0x53   :  { %1163 = vmatprep.mubr.bf16.mxu0 %v97_v41  ;;  %1208 = vmatpush3.bf16.msra.mxu0 %v1527_v39 }
  0x54   :  { %1209 = vmatprep.subr.bf16.mxu0 %v1531_v42 }
  0x57   :  { %1210 = vmatpush3.bf16.msra.mxu0 %v1531_v42 }
  0x58   :  { %1211 = vmatprep.subr.bf16.mxu0 %v1535_v44 }
  0x5a   :  { %1164 = vmatmul.mubr.bf16.gmra.mxu0 %v98_v45 }
  0x5b   :  { %1167 = vmatprep.mubr.bf16.mxu0 %v99_v46  ;;  %1212 = vmatpush3.bf16.msra.mxu0 %v1535_v44 }
  0x5c   :  { %1213 = vmatprep.subr.bf16.mxu0 %v1540_v48 }
  0x5f   :  { %1214 = vmatpush3.bf16.msra.mxu0 %v1540_v48 }
  0x60   :  { %1215 = vmatprep.subr.bf16.mxu0 %v1544_v50 }
  0x62   :  { %1168 = vmatmul.mubr.bf16.gmra.mxu0 %v100_v47 }
  0x63   :  { %1216 = vmatpush3.bf16.msra.mxu0 %v1544_v50  ;;  %1219 = vmatprep.mubr.bf16.mxu0 %v1286_v53 }
  0x64   :  { %1217 = vmatprep.subr.bf16.mxu0 %v1548_v52 }
  0x67   :  { %1218 = vmatpush3.bf16.msra.mxu0 %v1548_v52 }
  0x6a   :  { %1220 = vmatmul.mubr.bf16.vlgmr.msra.gmra.mxu0 %v1287_v54  ;;  %v1293_v54 = vld [vmem:[%s1621_s2 + $0x38] sm:$0xff]  }
  0x6b   :  { %1223 = vmatprep.mubr.bf16.mxu0 %v1288_v55 }
  0x72   :  { %1224 = vmatmul.mubr.bf16.gmra.mxu0 %v1289_v56 }
  0xa5   :  { %v363_v57 = vpop.permute.xlu1 %362 }
  0xa7   :  { %v353_v58 = vpop.permute.xlu0 %352 }
  0xa9   :  { %v368_v59 = vpop.permute.xlu1 %367 }
  0xab   :  { %v358_v60 = vpop.permute.xlu0 %357 }
  0xad   :  { %v378_v61 = vpop.permute.xlu1 %377 }
  0xaf   :  { %v373_v63 = vpop.permute.xlu0 %372 }
  0xb1   :  { %v388_v2 = vpop.permute.xlu1 %387 }
  0xb3   :  { %v383_v5 = vpop.permute.xlu0 %382 }
  0xb5   :  { %v398_v13 = vpop.permute.xlu1 %397 }
  0xb7   :  { %v393_v15 = vpop.permute.xlu0 %392 }
  0xb9   :  { %v408_v22 = vpop.permute.xlu1 %407 }
  0xbb   :  { %v403_v26 = vpop.permute.xlu0 %402 }
  0xbd   :  { %v418_v30 = vpop.permute.xlu1 %417 }
 0x10a   :  { %v1157_v62 = vpop.f32.mrf.mxu0 }
 0x10b   :  { %v432_v8 = vmul.f32 %v1157_v62, %v363_v57 }
 0x10c   :  { %v220_v0 = vpop.f32.mrf.mxu0 }
 0x10d   :  { %v430_v6 = vmul.f32 %v353_v58, %v220_v0 }
 0x10e   :  { %v1158_v1 = vpop.f32.mrf.mxu0 }
 0x10f   :  { %v433_v3 = vmul.f32 %v1158_v1, %v368_v59 }
 0x110   :  { %v223_v4 = vpop.f32.mrf.mxu0 }
 0x111   :  { %v431_v7 = vmul.f32 %v358_v60, %v223_v4  ;;  %v447_v11 = vpack.c.bf16 %v433_v3, %v432_v8 }
 0x112   :  { %v1161_v9 = vpop.f32.mrf.mxu0 }
 0x113   :  { %v446_v10 = vpack.c.bf16 %v431_v7, %v430_v6  ;;  %v436_v20 = vmul.f32 %v1161_v9, %v383_v5 }
 0x114   :  { %v236_v12 = vpop.f32.mrf.mxu0 }
 0x115   :  { %1187 = vmatprep.mubr.bf16.mxu1 %v446_v10  ;;  %v434_v18 = vmul.f32 %v373_v63, %v236_v12 }
 0x116   :  { %v1162_v14 = vpop.f32.mrf.mxu0  ;;  %1188 = vmatmul.mubr.bf16.vlgmr.msra.gmra.mxu1 %v447_v11 }
 0x117   :  { %1243 = vmatpush3.bf16.msra.mxu1 %v1507_v28  ;;  %v437_v16 = vmul.f32 %v1162_v14, %v388_v2 }
 0x118   :  { %v239_v17 = vpop.f32.mrf.mxu0  ;;  %1236 = vmatprep.subr.bf16.mxu1 %v1516_v34 }
 0x119   :  { %v435_v19 = vmul.f32 %v378_v61, %v239_v17  ;;  %v449_v24 = vpack.c.bf16 %v437_v16, %v436_v20 }
 0x11a   :  { %v1165_v21 = vpop.f32.mrf.mxu0 }
 0x11b   :  { %v448_v23 = vpack.c.bf16 %v435_v19, %v434_v18  ;;  %1244 = vmatpush3.bf16.msra.mxu1 %v1516_v34  ;;  %v440_v33 = vmul.f32 %v1165_v21, %v403_v26  ;;  %v413_v34 = vpop.permute.xlu0 %412 }
 0x11c   :  { %v252_v25 = vpop.f32.mrf.mxu0  ;;  %1237 = vmatprep.subr.bf16.mxu1 %v1527_v39 }
 0x11d   :  { %1191 = vmatprep.mubr.bf16.mxu1 %v448_v23  ;;  %v438_v31 = vmul.f32 %v393_v15, %v252_v25 }
 0x11e   :  { %v1166_v27 = vpop.f32.mrf.mxu0  ;;  %1192 = vmatmul.mubr.bf16.gmra.mxu1 %v449_v24 }
 0x11f   :  { %1245 = vmatpush3.bf16.msra.mxu1 %v1527_v39  ;;  %v441_v28 = vmul.f32 %v1166_v27, %v408_v22  ;;  %v428_v39 = vpop.permute.xlu1 %427  ;;  %v423_v45 = vpop.permute.xlu0 %422 }
 0x120   :  { %v255_v29 = vpop.f32.mrf.mxu0  ;;  %1238 = vmatprep.subr.bf16.mxu1 %v1531_v42 }
 0x121   :  { %v439_v32 = vmul.f32 %v398_v13, %v255_v29  ;;  %v451_v37 = vpack.c.bf16 %v441_v28, %v440_v33 }
 0x122   :  { %v1169_v35 = vpop.f32.mrf.mxu0 }
 0x123   :  { %v450_v36 = vpack.c.bf16 %v439_v32, %v438_v31  ;;  %1246 = vmatpush3.bf16.msra.mxu1 %v1531_v42  ;;  %v444_v49 = vmul.f32 %v1169_v35, %v423_v45  ;;  %v1290_v42 = vld [vmem:[%s1621_s2 + $0x20] sm:$0xff]  }
 0x124   :  { %v268_v38 = vpop.f32.mrf.mxu0  ;;  %1239 = vmatprep.subr.bf16.mxu1 %v1535_v44 }
 0x125   :  { %1195 = vmatprep.mubr.bf16.mxu1 %v450_v36  ;;  %v442_v46 = vmul.f32 %v413_v34, %v268_v38 }
 0x126   :  { %v1170_v40 = vpop.f32.mrf.mxu0  ;;  %1196 = vmatmul.mubr.bf16.gmra.mxu1 %v451_v37 }
 0x127   :  { %1247 = vmatpush3.bf16.msra.mxu1 %v1535_v44  ;;  %v445_v41 = vmul.f32 %v1170_v40, %v428_v39  ;;  %v1291_v44 = vld [vmem:[%s1621_s2 + $0x28] sm:$0xff]  }
 0x128   :  { %v271_v43 = vpop.f32.mrf.mxu0  ;;  %1240 = vmatprep.subr.bf16.mxu1 %v1540_v48 }
 0x129   :  { %v443_v47 = vmul.f32 %v418_v30, %v271_v43  ;;  %v453_v53 = vpack.c.bf16 %v445_v41, %v444_v49 }
 0x12b   :  { %v452_v51 = vpack.c.bf16 %v443_v47, %v442_v46  ;;  %1248 = vmatpush3.bf16.msra.mxu1 %v1540_v48  ;;  %v1292_v48 = vld [vmem:[%s1621_s2 + $0x30] sm:$0xff]   ;;  %s1388_s2 = smov [#allocation9]  }
 0x12c   :  { %1241 = vmatprep.subr.bf16.mxu1 %v1544_v50 }
 0x12d   :  { %1199 = vmatprep.mubr.bf16.mxu1 %v452_v51 }
 0x12e   :  { %1200 = vmatmul.mubr.bf16.gmra.mxu1 %v453_v53 }
 0x12f   :  { %1249 = vmatpush3.bf16.msra.mxu1 %v1544_v50  ;;  %1227 = vmatprep.mubr.bf16.mxu1 %v1290_v42  ;;  %v1221_v50 = vpop.f32.mrf.mxu0 }
 0x130   :  { %1242 = vmatprep.subr.bf16.mxu1 %v1548_v52 }
 0x131   :  { %v777_v55 = vpop.f32.mrf.mxu0 }
 0x133   :  { %1250 = vmatpush3.bf16.msra.mxu1 %v1548_v52  ;;  %v1222_v56 = vpop.f32.mrf.mxu0  ;;  %v1595_v52 = vld [vmem:[%s1625_s6] ss:$0 sm:$0xff]  ;;  %s964_s6 = sshll.u32 %s1388_s2, 4  ;;  %s965_s6 = int_to_ptr.vmem [resolvable:$true] %s964_s6 }
 0x134   :  { %s1354_s1 = scalar_lea.vmem %s965_s6, 1024  ;;  %p1359_p2 = scmp.lt.s32.totalorder %s965_s6, %s965_s6 }
 0x135   :  { %v780_v57 = vpop.f32.mrf.mxu0  ;;  %p1355_p1 = scmp.ne.s32.totalorder %s965_s6, %s1354_s1  ;;  %p1360_p3 = scmp.lt.s32.totalorder %s1354_s1, %s1354_s1 }
 0x136   :  { %1228 = vmatmul.mubr.bf16.vlgmr.msra.gmra.mxu1 %v1291_v44 }
 0x137   :  { %1231 = vmatprep.mubr.bf16.mxu1 %v1292_v48  ;;  %v1225_v59 = vpop.f32.mrf.mxu0  ;;  %p1361_p4 = por %p1360_p3, %p1359_p2 }
 0x139   :  { %v793_v0 = vpop.f32.mrf.mxu0  ;;  %p1362_p5 = pnand %p1361_p4, %p1355_p1 }
 0x13b   :  { %v1226_v8 = vpop.f32.mrf.mxu0 }
 0x13d   :  { %v796_v19 = vpop.f32.mrf.mxu0 }
 0x13e   :  { %1232 = vmatmul.mubr.bf16.gmra.mxu1 %v1293_v54 }
 0x1d6   :  { %v1189_v58 = vpop.f32.mrf.mxu1 }
 0x1d7   :  { %v786_v60 = vadd.f32 %v1221_v50, %v1189_v58 }
 0x1d8   :  { %v584_v61 = vpop.f32.mrf.mxu1 }
 0x1d9   :  { %v778_v62 = vadd.f32 %v777_v55, %v584_v61  ;;  %v849_v1 = vadd.f32 %v1595_v52, %v786_v60 }
 0x1da   :  { %v1190_v63 = vpop.f32.mrf.mxu1 }
 0x1db   :  { %v789_v2 = vadd.f32 %v1222_v56, %v1190_v63  ;;  %v847_v4 = vadd.f32 %v1595_v52, %v778_v62  ;;  %v865_v9 = vmax.f32 %v849_v1, 0.0 }
 0x1dc   :  { %v587_v3 = vpop.f32.mrf.mxu1 }
 0x1dd   :  { %v850_v5 = vadd.f32 %v1595_v52, %v789_v2  ;;  %v781_v6 = vadd.f32 %v780_v57, %v587_v3  ;;  %v863_v14 = vmax.f32 %v847_v4, 0.0 }
 0x1de   :  { %v1193_v7 = vpop.f32.mrf.mxu1 }
 0x1df   :  { %v866_v10 = vmax.f32 %v850_v5, 0.0  ;;  %v848_v11 = vadd.f32 %v1595_v52, %v781_v6  ;;  %v802_v12 = vadd.f32 %v1225_v59, %v1193_v7 }
 0x1e0   :  { %v600_v13 = vpop.f32.mrf.mxu1 }
 0x1e1   :  { %v1052_v15 = vpack.c.bf16 %v866_v10, %v865_v9  ;;  %v864_v16 = vmax.f32 %v848_v11, 0.0  ;;  %v794_v17 = vadd.f32 %v793_v0, %v600_v13  ;;  %v853_v21 = vadd.f32 %v1595_v52, %v802_v12 }
 0x1e2   :  { %v1194_v18 = vpop.f32.mrf.mxu1 }
 0x1e3   :  { %1084 = vst [vmem:[#allocation9 + $0x8] sm:$0xff] %v1052_v15   ;;  %v1047_v20 = vpack.c.bf16 %v864_v16, %v863_v14  ;;  %v805_v22 = vadd.f32 %v1226_v8, %v1194_v18  ;;  %v851_v24 = vadd.f32 %v1595_v52, %v794_v17  ;;  %v869_v28 = vmax.f32 %v853_v21, 0.0 }
 0x1e4   :  { %v603_v23 = vpop.f32.mrf.mxu1 }
 0x1e5   :  { %1048 = vst [vmem:[#allocation9] sm:$0xff] %v1047_v20   ;;  %v854_v25 = vadd.f32 %v1595_v52, %v805_v22  ;;  %v797_v26 = vadd.f32 %v796_v19, %v603_v23  ;;  %v867_v32 = vmax.f32 %v851_v24, 0.0 }
 0x1e6   :  { %v1197_v27 = vpop.f32.mrf.mxu1 }
 0x1e7   :  { %v870_v29 = vmax.f32 %v854_v25, 0.0  ;;  %v852_v30 = vadd.f32 %v1595_v52, %v797_v26 }
 0x1e8   :  { %v616_v31 = vpop.f32.mrf.mxu1 }
 0x1e9   :  { %v1062_v33 = vpack.c.bf16 %v870_v29, %v869_v28  ;;  %v868_v35 = vmax.f32 %v852_v30, 0.0 }
 0x1ea   :  { %v1198_v34 = vpop.f32.mrf.mxu1 }
 0x1eb   :  { %1086 = vst [vmem:[#allocation9 + $0x18] sm:$0xff] %v1062_v33   ;;  %v1057_v36 = vpack.c.bf16 %v868_v35, %v867_v32 }
 0x1ec   :  { %v619_v37 = vpop.f32.mrf.mxu1 }
 0x1ed   :  { %1085 = vst [vmem:[#allocation9 + $0x10] sm:$0xff] %v1057_v36  }
 0x1ee   :  { %v1201_v38 = vpop.f32.mrf.mxu1 }
 0x1f0   :  { %v632_v40 = vpop.f32.mrf.mxu1 }
 0x1f2   :  { %v1202_v39 = vpop.f32.mrf.mxu1 }
 0x1f4   :  { %v635_v41 = vpop.f32.mrf.mxu1 }
 0x1f6   :  { %v1229_v43 = vpop.f32.mrf.mxu1 }
 0x1f7   :  { %v818_v45 = vadd.f32 %v1229_v43, %v1197_v27 }
 0x1f8   :  { %v809_v46 = vpop.f32.mrf.mxu1 }
 0x1f9   :  { %v810_v47 = vadd.f32 %v809_v46, %v616_v31  ;;  %v857_v51 = vadd.f32 %v1595_v52, %v818_v45 }
 0x1fa   :  { %v1230_v49 = vpop.f32.mrf.mxu1 }
 0x1fb   :  { %v821_v42 = vadd.f32 %v1230_v49, %v1198_v34  ;;  %v855_v44 = vadd.f32 %v1595_v52, %v810_v47  ;;  %v873_v55 = vmax.f32 %v857_v51, 0.0 }
 0x1fc   :  { %v812_v53 = vpop.f32.mrf.mxu1 }
 0x1fd   :  { %v858_v48 = vadd.f32 %v1595_v52, %v821_v42  ;;  %v813_v54 = vadd.f32 %v812_v53, %v619_v37  ;;  %v871_v60 = vmax.f32 %v855_v44, 0.0 }
 0x1fe   :  { %v1233_v50 = vpop.f32.mrf.mxu1 }
 0x1ff   :  { %v874_v56 = vmax.f32 %v858_v48, 0.0  ;;  %v856_v57 = vadd.f32 %v1595_v52, %v813_v54  ;;  %v834_v58 = vadd.f32 %v1233_v50, %v1201_v38 }
 0x200   :  { %v825_v59 = vpop.f32.mrf.mxu1 }
 0x201   :  { %v1072_v61 = vpack.c.bf16 %v874_v56, %v873_v55  ;;  %v872_v62 = vmax.f32 %v856_v57, 0.0  ;;  %v826_v63 = vadd.f32 %v825_v59, %v632_v40  ;;  %v861_v2 = vadd.f32 %v1595_v52, %v834_v58 }
 0x202   :  { %v1234_v0 = vpop.f32.mrf.mxu1 }
 0x203   :  { %1088 = vst [vmem:[#allocation9 + $0x28] sm:$0xff] %v1072_v61   ;;  %v1067_v1 = vpack.c.bf16 %v872_v62, %v871_v60  ;;  %v837_v3 = vadd.f32 %v1234_v0, %v1202_v39  ;;  %v859_v5 = vadd.f32 %v1595_v52, %v826_v63  ;;  %v877_v8 = vmax.f32 %v861_v2, 0.0 }
 0x204   :  { %v828_v4 = vpop.f32.mrf.mxu1 }
 0x205   :  { %1087 = vst [vmem:[#allocation9 + $0x20] sm:$0xff] %v1067_v1   ;;  %v862_v6 = vadd.f32 %v1595_v52, %v837_v3  ;;  %v829_v7 = vadd.f32 %v828_v4, %v635_v41  ;;  %v875_v11 = vmax.f32 %v859_v5, 0.0 }
 0x207   :  { %v878_v9 = vmax.f32 %v862_v6, 0.0  ;;  %v860_v10 = vadd.f32 %v1595_v52, %v829_v7 }
 0x209   :  { %v1082_v12 = vpack.c.bf16 %v878_v9, %v877_v8  ;;  %v876_v13 = vmax.f32 %v860_v10, 0.0 }
 0x20b   :  { %1090 = vst [vmem:[#allocation9 + $0x38] sm:$0xff] %v1082_v12   ;;  %v1077_v14 = vpack.c.bf16 %v876_v13, %v875_v11 }
 0x20d   :  { %1089 = vst [vmem:[#allocation9 + $0x30] sm:$0xff] %v1077_v14  }
 0x20e   :  { %1365 = shalt.err (!%p1362_p5)
}
 0x20f   :  { %970 = dma.vmem_to_hbm [thread:$0]  %s965_s6, 1024, %s1626_s7, [#allocation5], %s1381_s27, %s1381_s27, %s1382_s28  }
 0x210   :  { %1378 = dma.done.wait [#allocation5], 1024  }
 0x211   :  { %1379 = vsyncadd [#allocation5], 4294966272 }
 0x212   :  { %974 = vsyncpa [#allocation4], 1 }
 0x213   :  { %975 = vsyncpa [#allocation7], 1 }
 0x214   :  { %976 = vsyncpa [#allocation5], 1 }

</bundles_post_ra>
